<compile_context>
chip_gen: v5e
topology: v5e:2x2
jax: 0.10.0
libtpu: 0.0.40
codegen_flags: <defaults>
</compile_context>

<pallas_src>
import math
from collections import namedtuple

import jax
import jax.numpy as jnp
from jax.experimental import pallas as pl
from jax.experimental.pallas import tpu as pltpu

UNet2DConditionOutput = namedtuple("UNet2DConditionOutput", ["sample"])

# ----------------------------- model dims ---------------------------------
B = 2          # batch
C_IN = 4       # UNet in_channels (latent channels)
H = W = 16     # latent spatial
N = H * W      # tokens per image (lane axis, multiple of 128)
S = 8          # text sequence length
D_ENC = 32     # encoder_hidden_states dim
C = 32         # inner channel width
T_EMB = 32     # timestep embedding dim


def _silu(v):
    return v * jax.nn.sigmoid(v)


# ----------------------------- Pallas kernel -------------------------------
def _unet_block_kernel(x_ref, ehs_ref, wslab_ref, bias_ref, o_ref):
    """One batch element per grid step; tokens on the lane axis.

    x_ref    : [1, C_IN, N]   latent tokens, channels on sublanes
    ehs_ref  : [1, S, D_ENC]  encoder hidden states
    wslab_ref: [4*C, 2*C]     packed static weights (single DMA)
                 rows   0:C          -> wkv = [wk | wv]          [D_ENC, 2C]
                 rows   C:2C , :C    -> wq^T * (1/sqrt(C))       [C, C]
                 rows  2C:3C , :C    -> wo^T                     [C, C]
                 rows  3C:4C , :C_IN          -> w_in^T          [C, C_IN]
                 rows  3C:4C , C_IN:2*C_IN    -> w_out           [C, C_IN]
    bias_ref : [C, 2]  col 0: b_in + time_emb_proj(silu(temb))   [C, 1]
                       col 1: b_out padded to C rows             [C, 1]
    o_ref    : [1, C_IN, N]
    """
    f32 = jnp.float32
    x = x_ref[0].astype(f32)        # [C_IN, N]
    ehs = ehs_ref[0].astype(f32)    # [S, D_ENC]

    w_kv = wslab_ref[0:C, :]                          # [D_ENC, 2C]
    w_q = wslab_ref[C:2 * C, 0:C]                     # [C, C] (scale folded)
    w_o = wslab_ref[2 * C:3 * C, 0:C]                 # [C, C]
    w_in = wslab_ref[3 * C:4 * C, 0:C_IN]             # [C, C_IN]
    w_out = wslab_ref[3 * C:4 * C, C_IN:2 * C_IN]     # [C, C_IN]
    bias_c = bias_ref[:, 0:1]                         # [C, 1]
    b_out = bias_ref[0:C_IN, 1:2]                     # [C_IN, 1]

    # conv_in (1x1) + fused bias (b_in + timestep injection) + SiLU.
    h = jnp.dot(w_in, x, preferred_element_type=f32) + bias_c       # [C, N]
    h = _silu(h)

    # cross-attention against encoder_hidden_states.
    q = jnp.dot(w_q, h, preferred_element_type=f32)                 # [C, N]
    kv = jnp.dot(ehs, w_kv, preferred_element_type=f32)             # [S, 2C]
    k = kv[:, 0:C]                                                  # [S, C]
    v = kv[:, C:2 * C]                                              # [S, C]
    scores = jnp.dot(k, q, preferred_element_type=f32)              # [S, N]
    m = jnp.max(scores, axis=0, keepdims=True)                      # [1, N]
    p = jnp.exp(scores - m)                                         # [S, N]
    inv = pl.reciprocal(jnp.sum(p, axis=0, keepdims=True), approx=True)
    attn = jax.lax.dot_general(                                     # [C, N]
        v, p, (((0,), (0,)), ((), ())), preferred_element_type=f32)
    attn = attn * inv                                               # normalize
    h = h + jnp.dot(w_o, attn, preferred_element_type=f32)

    # conv_out (1x1).
    out = jax.lax.dot_general(                                      # [C_IN, N]
        w_out, h, (((0,), (0,)), ((), ())), preferred_element_type=f32)
    o_ref[0] = (out + b_out).astype(o_ref.dtype)


def _unet_block_pallas(x_cn, ehs, w_slab, bias):
    b = x_cn.shape[0]
    return pl.pallas_call(
        _unet_block_kernel,
        out_shape=jax.ShapeDtypeStruct((b, C_IN, N), x_cn.dtype),
        grid_spec=pltpu.PrefetchScalarGridSpec(
            num_scalar_prefetch=0,
            grid=(b,),
            in_specs=[
                pl.BlockSpec((1, C_IN, N), lambda i: (i, 0, 0)),
                pl.BlockSpec((1, S, D_ENC), lambda i: (i, 0, 0)),
                pl.BlockSpec(w_slab.shape, lambda i: (0, 0)),
                pl.BlockSpec(bias.shape, lambda i: (0, 0)),
            ],
            out_specs=pl.BlockSpec((1, C_IN, N), lambda i: (i, 0, 0)),
        ),
        compiler_params=pltpu.CompilerParams(
            dimension_semantics=("parallel",)),
    )(x_cn, ehs, w_slab, bias)


# ----------------------------- wrapper module -------------------------------
class UNetWrapPallas:
    """Mirrors UNetWrap.forward semantics with a Pallas-backed mini UNet."""

    def __init__(self):
        self.in_channels = C_IN
        keys = jax.random.split(jax.random.PRNGKey(42), 16)
        norm = lambda k, shp, fan_in: (
            jax.random.normal(k, shp, jnp.float32) / math.sqrt(fan_in))

        # Time-embedding MLP params (applied as JAX glue in forward; the
        # timestep is a batch-invariant scalar, so this is hoisted out of
        # the kernel entirely).
        self.wt1 = norm(keys[0], (T_EMB, T_EMB), T_EMB)
        self.bt1 = jnp.zeros((1, T_EMB), jnp.float32)
        self.wt2 = norm(keys[1], (T_EMB, T_EMB), T_EMB)
        self.bt2 = jnp.zeros((1, T_EMB), jnp.float32)
        self.w_tp = norm(keys[3], (T_EMB, C), T_EMB)
        self.b_in = jnp.zeros((1, C), jnp.float32)

        w_in = norm(keys[2], (C_IN, C), C_IN)
        wq = norm(keys[4], (C, C), C)
        wk = norm(keys[5], (D_ENC, C), D_ENC)
        wv = norm(keys[6], (D_ENC, C), D_ENC)
        wo = norm(keys[7], (C, C), C)
        w_out = norm(keys[8], (C, C_IN), C)
        b_out = jnp.zeros((1, C_IN), jnp.float32)

        # Pack all static weights into one [4C, 2C] slab (one DMA per grid
        # step); fold the 1/sqrt(C) attention scale into wq and fuse wk/wv.
        slab = jnp.zeros((4 * C, 2 * C), jnp.float32)
        slab = slab.at[0:C, :].set(jnp.concatenate([wk, wv], axis=1))
        slab = slab.at[C:2 * C, 0:C].set((wq * (1.0 / math.sqrt(C))).T)
        slab = slab.at[2 * C:3 * C, 0:C].set(wo.T)
        slab = slab.at[3 * C:4 * C, 0:C_IN].set(w_in.T)
        slab = slab.at[3 * C:4 * C, C_IN:2 * C_IN].set(w_out)
        self.w_slab = slab
        self.b_out_col = (
            jnp.zeros((C, 1), jnp.float32).at[0:C_IN, 0].set(b_out[0]))

    def _sinusoidal_timestep_embedding(self, t):
        # t: [1] float. Sinusoidal embedding ([cos, sin]).
        # TODO(synk): diffusers' default Timesteps uses flip_sin_to_cos
        # ordering; irrelevant for the synthetic params used here.
        half = T_EMB // 2
        exponent = jnp.exp(
            -math.log(10000.0) * jnp.arange(half, dtype=jnp.float32) / half)
        args = t[:, None].astype(jnp.float32) * exponent[None, :]
        return jnp.concatenate([jnp.cos(args), jnp.sin(args)], axis=-1)  # [1, T_EMB]

    def forward(self, sample, timestep, encoder_hidden_states,
                cross_attention_kwargs=None):
        # sample: [B, C_IN, H, W] NCHW, timestep: scalar, ehs: [B, S, D_ENC]
        b = sample.shape[0]
        # torch: timestep.to(sample.dtype).expand((sample.shape[0],)).
        # The expanded values are identical, so the hoisted time-embedding MLP
        # is computed once and shared by every batch element / grid step.
        t = jnp.reshape(jnp.asarray(timestep).astype(sample.dtype), (1,))
        tsin = self._sinusoidal_timestep_embedding(t)                  # [1, T_EMB]
        t1 = _silu(jnp.dot(tsin, self.wt1) + self.bt1)
        temb = jnp.dot(t1, self.wt2) + self.bt2                        # [1, T_EMB]
        temb_c = jnp.dot(_silu(temb), self.w_tp)                       # [1, C]
        bias_c = (temb_c + self.b_in).reshape(C, 1)                    # [C, 1]
        bias = jnp.concatenate([bias_c, self.b_out_col], axis=1)       # [C, 2]

        # NCHW -> [B, C_IN, H*W]: pure reshape (channels stay on sublanes,
        # tokens land on the lane axis) -- no transposes.
        x_cn = sample.reshape(b, C_IN, H * W)

        out_cn = _unet_block_pallas(
            x_cn, encoder_hidden_states, self.w_slab, bias)            # [B, C_IN, HW]

        out = out_cn.reshape(b, C_IN, H, W).astype(sample.dtype)
        # UNetWrap returns the raw output tuple (return_dict=False); this
        # namedtuple IS a tuple and also exposes `.sample` for convenience.
        return UNet2DConditionOutput(sample=out)

    __call__ = forward


# ----------------------------------- main -----------------------------------
if __name__ == "__main__":
    key = jax.random.PRNGKey(0)
    k1, k2 = jax.random.split(key)

    sample = jax.random.normal(k1, (B, C_IN, H, W), jnp.float32)          # NCHW latents
    timestep = jnp.asarray(981, jnp.int32)                                # scalar timestep
    encoder_hidden_states = jax.random.normal(k2, (B, S, D_ENC), jnp.float32)

    model = UNetWrapPallas()
    out = model(sample, timestep, encoder_hidden_states)
    jax.block_until_ready(out.sample)

    assert out.sample.shape == sample.shape, out.sample.shape
    assert out.sample.dtype == sample.dtype, out.sample.dtype
    assert bool(jnp.all(jnp.isfinite(out.sample)))
    print("KERNEL_OK")
</pallas_src>

<mosaic_0001>
module attributes {stable_mosaic.version = 11 : i64} {
  func.func @_unet_block_kernel(%arg0: i32, %arg1: memref<1x4x256xf32, #tpu.memory_space<vmem>>, %arg2: memref<1x8x32xf32, #tpu.memory_space<vmem>>, %arg3: memref<128x64xf32, #tpu.memory_space<vmem>>, %arg4: memref<32x2xf32, #tpu.memory_space<vmem>>, %arg5: memref<1x4x256xf32, #tpu.memory_space<vmem>>) attributes {dimension_semantics = [#tpu.dimension_semantics<parallel>], iteration_bounds = array<i64: 2>, scalar_prefetch = 0 : i64, scratch_operands = 0 : i64, tpu.core_type = #tpu.core_type<tc>, window_params = [{transform_indices = @transform_0, window_bounds = array<i64: 1, 4, 256>}, {transform_indices = @transform_1, window_bounds = array<i64: 1, 8, 32>}, {pipeline_mode = #tpu.pipeline_mode<synchronous>, transform_indices = @transform_2, window_bounds = array<i64: 128, 64>}, {pipeline_mode = #tpu.pipeline_mode<synchronous>, transform_indices = @transform_3, window_bounds = array<i64: 32, 2>}, {transform_indices = @transform_4, window_bounds = array<i64: 1, 4, 256>}]} {
    %c0 = arith.constant 0 : index
    %c0_0 = arith.constant 0 : index
    %c0_1 = arith.constant 0 : index
    %0 = vector.load %arg1[%c0, %c0_0, %c0_1] : memref<1x4x256xf32, #tpu.memory_space<vmem>>, vector<1x4x256xf32>
    %1 = vector.shape_cast %0 : vector<1x4x256xf32> to vector<4x256xf32>
    %c0_2 = arith.constant 0 : index
    %c0_3 = arith.constant 0 : index
    %c0_4 = arith.constant 0 : index
    %2 = vector.load %arg2[%c0_2, %c0_3, %c0_4] : memref<1x8x32xf32, #tpu.memory_space<vmem>>, vector<1x8x32xf32>
    %3 = vector.shape_cast %2 : vector<1x8x32xf32> to vector<8x32xf32>
    %c0_5 = arith.constant 0 : index
    %c0_6 = arith.constant 0 : index
    %4 = vector.load %arg3[%c0_5, %c0_6] : memref<128x64xf32, #tpu.memory_space<vmem>>, vector<32x64xf32>
    %c32 = arith.constant 32 : index
    %c0_7 = arith.constant 0 : index
    %5 = vector.load %arg3[%c32, %c0_7] : memref<128x64xf32, #tpu.memory_space<vmem>>, vector<32x32xf32>
    %c64 = arith.constant 64 : index
    %c0_8 = arith.constant 0 : index
    %6 = vector.load %arg3[%c64, %c0_8] : memref<128x64xf32, #tpu.memory_space<vmem>>, vector<32x32xf32>
    %c96 = arith.constant 96 : index
    %c0_9 = arith.constant 0 : index
    %7 = vector.load %arg3[%c96, %c0_9] : memref<128x64xf32, #tpu.memory_space<vmem>>, vector<32x4xf32>
    %c96_10 = arith.constant 96 : index
    %c4 = arith.constant 4 : index
    %8 = vector.load %arg3[%c96_10, %c4] : memref<128x64xf32, #tpu.memory_space<vmem>>, vector<32x4xf32>
    %c0_11 = arith.constant 0 : index
    %c0_12 = arith.constant 0 : index
    %9 = vector.load %arg4[%c0_11, %c0_12] : memref<32x2xf32, #tpu.memory_space<vmem>>, vector<32x1xf32>
    %c0_13 = arith.constant 0 : index
    %c1 = arith.constant 1 : index
    %10 = vector.load %arg4[%c0_13, %c1] : memref<32x2xf32, #tpu.memory_space<vmem>>, vector<4x1xf32>
    %cst = arith.constant dense<0.000000e+00> : vector<32x256xf32>
    %11 = tpu.matmul %7, %1, %cst {dimension_numbers = #tpu.dot_dimension_numbers<[1], [0], [0], [1], [0, 0, 1, 1], [], []>} : vector<32x4xf32>, vector<4x256xf32>, vector<32x256xf32> -> vector<32x256xf32>
    %12 = vector.broadcast %9 : vector<32x1xf32> to vector<32x256xf32>
    %13 = arith.addf %11, %12 : vector<32x256xf32>
    %14 = arith.negf %13 : vector<32x256xf32>
    %15 = math.exp %14 : vector<32x256xf32>
    %cst_14 = arith.constant 1.000000e+00 : f32
    %16 = vector.broadcast %cst_14 : f32 to vector<32x256xf32>
    %17 = arith.addf %16, %15 : vector<32x256xf32>
    %18 = arith.divf %16, %17 : vector<32x256xf32>
    %19 = arith.mulf %13, %18 : vector<32x256xf32>
    %cst_15 = arith.constant dense<0.000000e+00> : vector<32x256xf32>
    %20 = tpu.matmul %5, %19, %cst_15 {dimension_numbers = #tpu.dot_dimension_numbers<[1], [0], [0], [1], [0, 0, 1, 1], [], []>} : vector<32x32xf32>, vector<32x256xf32>, vector<32x256xf32> -> vector<32x256xf32>
    %cst_16 = arith.constant dense<0.000000e+00> : vector<8x64xf32>
    %21 = tpu.matmul %3, %4, %cst_16 {dimension_numbers = #tpu.dot_dimension_numbers<[1], [0], [0], [1], [0, 0, 1, 1], [], []>} : vector<8x32xf32>, vector<32x64xf32>, vector<8x64xf32> -> vector<8x64xf32>
    %22 = vector.extract_strided_slice %21 {offsets = [0, 0], sizes = [8, 32], strides = [1, 1]} : vector<8x64xf32> to vector<8x32xf32>
    %23 = vector.extract_strided_slice %21 {offsets = [0, 32], sizes = [8, 32], strides = [1, 1]} : vector<8x64xf32> to vector<8x32xf32>
    %cst_17 = arith.constant dense<0.000000e+00> : vector<8x256xf32>
    %24 = tpu.matmul %22, %20, %cst_17 {dimension_numbers = #tpu.dot_dimension_numbers<[1], [0], [0], [1], [0, 0, 1, 1], [], []>} : vector<8x32xf32>, vector<32x256xf32>, vector<8x256xf32> -> vector<8x256xf32>
    %cst_18 = arith.constant dense<0xFF800000> : vector<256xf32>
    %25 = vector.multi_reduction <maximumf>, %24, %cst_18 [0] : vector<8x256xf32> to vector<256xf32>
    %26 = vector.shape_cast %25 : vector<256xf32> to vector<1x256xf32>
    %27 = vector.broadcast %26 : vector<1x256xf32> to vector<8x256xf32>
    %28 = arith.subf %24, %27 : vector<8x256xf32>
    %29 = math.exp %28 : vector<8x256xf32>
    %cst_19 = arith.constant dense<0.000000e+00> : vector<256xf32>
    %30 = vector.multi_reduction <add>, %29, %cst_19 [0] : vector<8x256xf32> to vector<256xf32>
    %31 = vector.shape_cast %30 : vector<256xf32> to vector<1x256xf32>
    %32 = tpu.reciprocal %31 {approx = true} : vector<1x256xf32> -> vector<1x256xf32>
    %cst_20 = arith.constant dense<0.000000e+00> : vector<32x256xf32>
    %33 = tpu.matmul %23, %29, %cst_20 {dimension_numbers = #tpu.dot_dimension_numbers<[0], [0], [1], [1], [0, 1, 1, 1], [], []>} : vector<8x32xf32>, vector<8x256xf32>, vector<32x256xf32> -> vector<32x256xf32>
    %34 = vector.broadcast %32 : vector<1x256xf32> to vector<32x256xf32>
    %35 = arith.mulf %33, %34 : vector<32x256xf32>
    %cst_21 = arith.constant dense<0.000000e+00> : vector<32x256xf32>
    %36 = tpu.matmul %6, %35, %cst_21 {dimension_numbers = #tpu.dot_dimension_numbers<[1], [0], [0], [1], [0, 0, 1, 1], [], []>} : vector<32x32xf32>, vector<32x256xf32>, vector<32x256xf32> -> vector<32x256xf32>
    %37 = arith.addf %19, %36 : vector<32x256xf32>
    %cst_22 = arith.constant dense<0.000000e+00> : vector<4x256xf32>
    %38 = tpu.matmul %8, %37, %cst_22 {dimension_numbers = #tpu.dot_dimension_numbers<[0], [0], [1], [1], [0, 1, 1, 1], [], []>} : vector<32x4xf32>, vector<32x256xf32>, vector<4x256xf32> -> vector<4x256xf32>
    %39 = vector.broadcast %10 : vector<4x1xf32> to vector<4x256xf32>
    %40 = arith.addf %38, %39 : vector<4x256xf32>
    %c0_23 = arith.constant 0 : index
    %c0_24 = arith.constant 0 : index
    %c0_25 = arith.constant 0 : index
    %41 = vector.load %arg5[%c0_23, %c0_24, %c0_25] : memref<1x4x256xf32, #tpu.memory_space<vmem>>, vector<1x4x256xf32>
    %42 = vector.shape_cast %41 : vector<1x4x256xf32> to vector<4x256xf32>
    %43 = vector.shape_cast %40 : vector<4x256xf32> to vector<1x4x256xf32>
    tpu.vector_store %arg5[%c0_23, %c0_24, %c0_25], %43 {strides = array<i32>} : memref<1x4x256xf32, #tpu.memory_space<vmem>>, vector<1x4x256xf32>,
    return
  }
  func.func @transform_0(%arg0: i32) -> (i32, i32, i32) {
    %c0_i32 = arith.constant 0 : i32
    %c0_i32_0 = arith.constant 0 : i32
    %c0_i32_1 = arith.constant 0 : i32
    return %arg0, %c0_i32, %c0_i32_0 : i32, i32, i32
  }
  func.func @transform_1(%arg0: i32) -> (i32, i32, i32) {
    %c0_i32 = arith.constant 0 : i32
    %c0_i32_0 = arith.constant 0 : i32
    %c0_i32_1 = arith.constant 0 : i32
    return %arg0, %c0_i32, %c0_i32_0 : i32, i32, i32
  }
  func.func @transform_2(%arg0: i32) -> (i32, i32) {
    %c0_i32 = arith.constant 0 : i32
    %c0_i32_0 = arith.constant 0 : i32
    %c0_i32_1 = arith.constant 0 : i32
    return %c0_i32, %c0_i32_0 : i32, i32
  }
  func.func @transform_3(%arg0: i32) -> (i32, i32) {
    %c0_i32 = arith.constant 0 : i32
    %c0_i32_0 = arith.constant 0 : i32
    %c0_i32_1 = arith.constant 0 : i32
    return %c0_i32, %c0_i32_0 : i32, i32
  }
  func.func @transform_4(%arg0: i32) -> (i32, i32, i32) {
    %c0_i32 = arith.constant 0 : i32
    %c0_i32_0 = arith.constant 0 : i32
    %c0_i32_1 = arith.constant 0 : i32
    return %arg0, %c0_i32, %c0_i32_0 : i32, i32, i32
  }
}

</mosaic_0001>

<bundles_post_ra>
// kernel: tpu_custom_call.1
= control target key start
LH: loop header
LB: loop body
LE: loop exit
PB: predicated region body
PF: predicated region fallthrough
CT: control target
= control target key end

     0   :  { %9 = vsyncpa [#allocation3], 0  ;;  %s1759_s0 = inlined_call_operand.vmem [shape: f32[2,4,256], index: 0, kind: input, shape index: {}]   ;;  %s1760_s1 = inlined_call_operand.vmem [shape: f32[2,8,32], index: 1, kind: input, shape index: {}]   ;;  %s1761_s2 = inlined_call_operand.vmem [shape: f32[128,64], index: 2, kind: input, shape index: {}]   ;;  %s1762_s3 = inlined_call_operand.vmem [shape: f32[32,2], index: 3, kind: input, shape index: {}]   ;;  %s1763_s4 = inlined_call_operand.hbm [shape: f32[2,4,256], index: 4, kind: output, shape index: {}]  }
   0x1   :  { %11 = vsyncpa [#allocation3 + $0x1], 0  ;;  %s1286_s15 = smov 0   ;;  %s1288_s16 = smov 0  }
   0x2   :  { %s1290_s17 = smov 0   ;;  %s1292_s18 = smov 0  }
   0x3 LB: > { %s1307_s19 = sadd.s32 4294967295, %s1255_s18   ;;  %s1043_s20 = sadd.s32 4294967294, %s1255_s18   ;;  %s1255_s18 = sphi %s1292_s18, %s1813_s18   ;;  %s1251_s17 = sphi %s1290_s17, %s1812_s17   ;;  %s1247_s16 = sphi %s1288_s16, %s1811_s16   ;;  %s1243_s15 = sphi %s1286_s15, %s1810_s15  }
   0x4   : > { %s1311_s21 = sadd.s32 1, %s1255_s18   ;;  %s118_s22 = sadd.s32 1, %s1251_s17 }
   0x5   : > { %s115_s23 = ssub.s32 %s1255_s18, %s1311_s21  ;;  %p128_p0 = scmp.ne.s32.totalorder %s1251_s17, %s1247_s16 }
   0x6   : > { %p116_p1 = scmp.eq.s32.totalorder %s115_s23, 0  ;;  %p129_p2 = scmp.eq.s32.totalorder %s1307_s19, 1 }
   0x7   : > { %p134_p3 = scmp.ne.s32.totalorder %s1247_s16, %s1243_s15  ;;  %p135_p4 = scmp.eq.s32.totalorder %s1043_s20, 1 }
   0x8   : > { %s1322_s24 = scalar_select %p116_p1, %s1251_s17, %s118_s22  }
   0x9   : > { %p1324_p5 = por %p129_p2, %p128_p0  ;;  %p1328_p6 = por %p135_p4, %p134_p3 }
   0xa   : > { %p1046_p7 = scmp.ge.s32.totalorder %s1255_s18, 1  ;;  %p174_p8 = scmp.lt.s32.totalorder %s1255_s18, 3 }
   0xc   : > { %p175_p9 = pnand %p1046_p7, %p174_p8 }
   0xd   : > { %p204_p10 = scmp.lt.s32.totalorder (!%p175_p9), %s1307_s19, 1  ;;  %s1259_s10 = smov (!%p175_p9), 124  }
   0xe   : > { %178 = sbr.rel (%p175_p9) target bundleno = 1001 (0x3e9), region = 36  ;;  %s201_s28 = sand.u32 (!%p175_p9), 1, %s1247_s16  }
   0xf   : > { %s1047_s30 = sshll.u32 (!%p175_p9), %s201_s28, 3  ;;  %s1104_s5 = sshll.u32 (!%p175_p9), %s1307_s19, 3 }
  0x10   : > { %s1213_s23 = scalar_lea.hbm (!%p175_p9), %s1763_s4, 16 }
  0x13   : > { %v232_v0 = vld [vmem:[%s1762_s3 + $0x8] sm:$0xff]  ;;  %v1257_v1 = vmov 0   ;;  %s1339_s29 = scalar_select %p204_p10, %s1307_s19, 1  ;;  %v234_v2 = vld [vmem:[%s1762_s3 + $0x18] sm:$0xff]  ;;  %v231_v4 = vld [vmem:[%s1762_s3] sm:$0xff]  ;;  %vm1764_vm0 = vcmask 1043456  }
  0x14   : > { %1150 = vset.pattern.permute.xlu1 %v1257_v1  ;;  %1149 = vset.pattern.permute.xlu0 %v1257_v1  ;;  %v233_v5 = vld [vmem:[%s1762_s3 + $0x10] sm:$0xff]  ;;  %v1359_v6 = vld [vmem:[%s1761_s2 + $0x60] sm:$0xff]  ;;  %vm260_vm1 = vcmask 31744   ;;  %v1368_v9 = vld [vmem:[%s1761_s2 + $0x68] sm:$0xff]  ;;  %vm1765_vm2 = vcmask 261120   ;;  %s956_s19 = scalar_lea.sflag [#allocation3], %s201_s28 }
  0x15   : > { %243 = vperm.xlu1 %1150, %v232_v0   ;;  %253 = vperm.xlu0 %1149, %v234_v2   ;;  %s1103_s6 = sshll.u32 %s1339_s29, 3  ;;  %v1375_v10 = vld [vmem:[%s1761_s2 + $0x70] sm:$0xff]  ;;  %v1382_v11 = vld [vmem:[%s1761_s2 + $0x78] sm:$0xff]  ;;  %v216_v14 = vld [vmem:[%s1761_s2 + $0x8] sm:$0xff] }
  0x16   : > { %s208_s9 = scalar_lea.vmem %s1759_s0, %s1103_s6  ;;  %v218_v12 = vld [vmem:[%s1761_s2 + $0x18] sm:$0xff]  ;;  %v217_v13 = vld [vmem:[%s1761_s2 + $0x10] sm:$0xff]  ;;  %s212_s20 = scalar_lea.vmem %s1760_s1, %s1103_s6  ;;  %v215_v15 = vld [vmem:[%s1761_s2] sm:$0xff] }
  0x17   : > { %v213_v3 = vld [vmem:[%s208_s9] sm:$0xff]  ;;  %s1258_s9 = smov 96  }
  0x18   : > { %257 = vst [vmem:[#allocation1] ss:$2 sm:$0xff] %v213_v3  ;;  %v214_v16 = vld [vmem:[%s212_s20] sm:$0xff] }
  0x1d   : > { %238 = vperm.xlu1 %1150, %v231_v4   ;;  %248 = vperm.xlu0 %1149, %v233_v5  }
  0x1f   : > { %v258_v7 = vld.sshfl [vmem:[#allocation1] sm:$0xff pattern:$0x75316420]  ;;  %v259_v8 = vld.sshfl [vmem:[#allocation1 + $0x8] sm:$0xff pattern:$0x75316420] }
  0x20   : > { %1051 = vmatpush.msk.msra.mxu0 %vm1764_vm0, %v258_v7  ;;  %1056 = vmatpush.msk.msra.mxu1 %vm1764_vm0, %v259_v8 }
  0x21   : > { %1052 = vmatmul.msk.f32.vlgmr.msra.gmra.mxu0 %vm260_vm1, %v1359_v6  ;;  %1057 = vmatmul.msk.f32.vlgmr.msra.gmra.mxu1 %vm260_vm1, %v1359_v6 }
  0x22   : > { %582 = vmatpush.msrb.mxu0 %v218_v12 }
  0x24   : > { %583 = vmatpush.msrb.mxu0 %v217_v13 }
  0x25   : > { %862 = vrot.lane.b32.xlu0 %v1359_v6, %s1259_s10  ;;  %864 = vrot.lane.b32.xlu1 %v1368_v9, %s1259_s10 }
  0x26   : > { %584 = vmatpush.msrb.mxu0 %v216_v14 }
  0x28   : > { %585 = vmatpush.msrb.mxu0 %v215_v15 }
  0x29   : > { %1053 = vmatmul.msk.f32.gmra.mxu0 %vm260_vm1, %v1368_v9  ;;  %1058 = vmatmul.msk.f32.gmra.mxu1 %vm260_vm1, %v1368_v9 }
  0x2d   : > { %866 = vrot.lane.b32.xlu0 %v1375_v10, %s1259_s10  ;;  %868 = vrot.lane.b32.xlu1 %v1382_v11, %s1259_s10  ;;  %s203_s10 = scalar_lea.vmem [#allocation2], %s1047_s30 }
  0x2e   : > { %s969_s11 = sshll.u32 %s203_s10, 4  ;;  %s970_s11 = int_to_ptr.vmem [resolvable:$true] %s969_s11 }
  0x31   : > { %1054 = vmatmul.msk.f32.gmra.mxu0 %vm260_vm1, %v1375_v10  ;;  %1059 = vmatmul.msk.f32.gmra.mxu1 %vm260_vm1, %v1375_v10 }
  0x39   : > { %1055 = vmatmul.msk.f32.gmra.mxu0 %vm260_vm1, %v1382_v11  ;;  %1060 = vmatmul.msk.f32.gmra.mxu1 %vm260_vm1, %v1382_v11 }
  0x41   : > { %1077 = vmatmul.msk.f32.vlgmr.msrb.gmra.mxu0 %vm1765_vm2, %v214_v16 }
  0x87   : > { %v244_v17 = vpop.permute.xlu1 %243  ;;  %v254_v23 = vpop.permute.xlu0 %253 }
  0x8f   : > { %v239_v18 = vpop.permute.xlu1 %238  ;;  %v249_v33 = vpop.permute.xlu0 %248 }
  0x9e   : > { %v295_v19 = vpop.f32.mrf.mxu0  ;;  %v324_v20 = vpop.f32.mrf.mxu1 }
  0x9f   : > { %v1404_v21 = vadd.f32 %v295_v19, %v239_v18  ;;  %v1407_v24 = vadd.f32 %v324_v20, %v239_v18 }
  0xa1   : > { %v1061_v22 = vmul.f32 -1.442695, %v1404_v21  ;;  %v1062_v27 = vmul.f32 -1.442695, %v1407_v24 }
  0xa3   : > { %1153 = vpow2.f32 %v1061_v22 }
  0xa4   : > { %1155 = vpow2.f32 %v1062_v27 }
  0xa6   : > { %v298_v25 = vpop.f32.mrf.mxu0  ;;  %v327_v26 = vpop.f32.mrf.mxu1 }
  0xa7   : > { %v1410_v28 = vadd.f32 %v298_v25, %v244_v17  ;;  %v1412_v29 = vadd.f32 %v327_v26, %v244_v17 }
  0xa9   : > { %v1063_v30 = vmul.f32 -1.442695, %v1410_v28  ;;  %v1154_v31 = vpop.eup %1153  ;;  %v1064_v32 = vmul.f32 -1.442695, %v1412_v29 }
  0xaa   : > { %v1416_v34 = vadd.f32 1.0, %v1154_v31  ;;  %v1156_v39 = vpop.eup %1155 }
  0xab   : > { %1157 = vpow2.f32 %v1063_v30  ;;  %v1425_v44 = vadd.f32 1.0, %v1156_v39 }
  0xac   : > { %1159 = vpow2.f32 %v1064_v32  ;;  %vm373_vm3 = vweird.f32 %v1416_v34  ;;  %v379_v0 = vand.u32 2147483648, %v1416_v34  ;;  %v377_v12 = vand.u32 2147483647, %v1416_v34 }
  0xad   : > { %1161 = vrcp.f32 %v1416_v34  ;;  %v392_v13 = vand.u32 2147483647, %v1425_v44  ;;  %v394_v14 = vand.u32 2147483648, %v1425_v44 }
  0xae   : > { %v301_v35 = vpop.f32.mrf.mxu0  ;;  %v330_v36 = vpop.f32.mrf.mxu1  ;;  %v1483_v22 = vor.u32 1.1754944e-38, %v379_v0 }
  0xaf   : > { %v1418_v37 = vadd.f32 %v301_v35, %v249_v33  ;;  %v1420_v38 = vadd.f32 %v330_v36, %v249_v33 }
  0xb1   : > { %v1065_v40 = vmul.f32 -1.442695, %v1418_v37  ;;  %v1066_v41 = vmul.f32 -1.442695, %v1420_v38  ;;  %v1158_v42 = vpop.eup %1157 }
  0xb2   : > { %v1160_v43 = vpop.eup %1159  ;;  %v1427_v45 = vadd.f32 1.0, %v1158_v42 }
  0xb3   : > { %1163 = vpow2.f32 %v1065_v40  ;;  %v1429_v46 = vadd.f32 1.0, %v1160_v43  ;;  %v1431_v49 = vpop.eup %1161 }
  0xb4   : > { %1165 = vpow2.f32 %v1066_v41  ;;  %v369_v56 = vmul.f32 %v1431_v49, %v1416_v34  ;;  %v409_v17 = vand.u32 2147483648, %v1427_v45  ;;  %vm374_vm4 = vweird.f32 %v1431_v49 }
  0xb5   : > { %1167 = vrcp.f32 %v1425_v44  ;;  %vm403_vm5 = vweird.f32 %v1427_v45  ;;  %v407_v31 = vand.u32 2147483647, %v1427_v45  ;;  %v422_v36 = vand.u32 2147483647, %v1429_v46  ;;  %vm1504_vm7 = vmor %vm373_vm3, %vm374_vm4 }
  0xb6   : > { %v304_v47 = vpop.f32.mrf.mxu0  ;;  %v333_v48 = vpop.f32.mrf.mxu1  ;;  %1169 = vrcp.f32 %v1427_v45  ;;  %v370_v60 = vsub.f32 1.0, %v369_v56  ;;  %v1493_v33 = vor.u32 1.1754944e-38, %v409_v17  ;;  %v424_v41 = vand.u32 2147483648, %v1429_v46 }
  0xb7   : > { %v1433_v50 = vadd.f32 %v304_v47, %v254_v23  ;;  %v1435_v51 = vadd.f32 %v333_v48, %v254_v23  ;;  %1171 = vrcp.f32 %v1429_v46  ;;  %vm1534_vm1 = vcmp.eq.f32.partialorder %v407_v31, 8.507059e+37 }
  0xb8   : > { %v371_v4 = vmul.f32 %v1431_v49, %v370_v60  ;;  %vm1552_vm3 = vcmp.eq.f32.partialorder %v377_v12, 8.507059e+37 }
  0xb9   : > { %v1164_v52 = vpop.eup %1163  ;;  %v1067_v53 = vmul.f32 -1.442695, %v1433_v50  ;;  %v1068_v54 = vmul.f32 -1.442695, %v1435_v51 }
  0xba   : > { %v1442_v55 = vadd.f32 1.0, %v1164_v52  ;;  %v1166_v57 = vpop.eup %1165  ;;  %v1487_v25 = vadd.f32 %v1431_v49, %v371_v4 }
  0xbb   : > { %1173 = vpow2.f32 %v1067_v53  ;;  %v1447_v58 = vadd.f32 1.0, %v1166_v57  ;;  %v1449_v59 = vpop.eup %1167  ;;  %v425_v53 = vor.u32 1.1754944e-38, %v424_v41 }
  0xbc   : > { %1175 = vrcp.f32 %v1442_v55  ;;  %v1452_v61 = vpop.eup %1169  ;;  %v384_v5 = vmul.f32 %v1449_v59, %v1425_v44  ;;  %v437_v27 = vand.u32 2147483647, %v1442_v55  ;;  %v439_v32 = vand.u32 2147483648, %v1442_v55 }
  0xbd   : > { %1177 = vpow2.f32 %v1068_v54  ;;  %v1454_v62 = vpop.eup %1171  ;;  %v399_v3 = vmul.f32 %v1452_v61, %v1427_v45  ;;  %v452_v40 = vand.u32 2147483647, %v1447_v58  ;;  %vm404_vm6 = vweird.f32 %v1452_v61 }
  0xbe   : > { %1179 = vrcp.f32 %v1447_v58  ;;  %v414_v18 = vmul.f32 %v1454_v62, %v1429_v46  ;;  %v385_v26 = vsub.f32 1.0, %v384_v5  ;;  %vm433_vm8 = vweird.f32 %v1442_v55  ;;  %vm1548_vm2 = vmor %vm403_vm5, %vm404_vm6 }
  0xbf   : > { %v400_v23 = vsub.f32 1.0, %v399_v3  ;;  %v376_v48 = vsel %vm1504_vm7, %v1431_v49, %v1487_v25  ;;  %vm1517_vm10 = vcmp.eq.f32.partialorder %v437_v27, 8.507059e+37  ;;  %vm448_vm11 = vweird.f32 %v1447_v58 }
  0xc0   : > { %v415_v35 = vsub.f32 1.0, %v414_v18  ;;  %v386_v52 = vmul.f32 %v1449_v59, %v385_v26  ;;  %v440_v57 = vor.u32 1.1754944e-38, %v439_v32  ;;  %v454_v60 = vand.u32 2147483648, %v1447_v58 }
  0xc1   : > { %v1174_v63 = vpop.eup %1173  ;;  %v401_v47 = vmul.f32 %v1452_v61, %v400_v23  ;;  %vm419_vm13 = vweird.f32 %v1454_v62  ;;  %vm1530_vm15 = vcmp.eq.f32.partialorder %v452_v40, 8.507059e+37  ;;  %v381_v41 = vsel %vm1552_vm3, %v1483_v22, %v376_v48 }
  0xc2   : > { %v1458_v1 = vpop.eup %1175  ;;  %v1460_v2 = vadd.f32 1.0, %v1174_v63  ;;  %v416_v63 = vmul.f32 %v1454_v62, %v415_v35  ;;  %vm393_vm7 = vcmp.eq.f32.partialorder %v392_v13, 8.507059e+37 }
  0xc3   : > { %v1178_v7 = vpop.eup %1177  ;;  %v429_v8 = vmul.f32 %v1458_v1, %v1442_v55  ;;  %vm434_vm14 = vweird.f32 %v1458_v1  ;;  %v402_v18 = vadd.f32 %v1452_v61, %v401_v47  ;;  %v387_v47 = vadd.f32 %v1449_v59, %v386_v52 }
  0xc4   : > { %v1472_v15 = vpop.eup %1179  ;;  %1181 = vrcp.f32 %v1460_v2  ;;  %v1475_v16 = vadd.f32 1.0, %v1178_v7  ;;  %v469_v17 = vand.u32 2147483648, %v1460_v2  ;;  %vm463_vm12 = vweird.f32 %v1460_v2  ;;  %vm1563_vm9 = vmor %vm433_vm8, %vm434_vm14 }
  0xc5   : > { %v430_v19 = vsub.f32 1.0, %v429_v8  ;;  %v444_v20 = vmul.f32 %v1472_v15, %v1447_v58  ;;  %v467_v8 = vand.u32 2147483647, %v1460_v2  ;;  %vm449_vm4 = vweird.f32 %v1472_v15 }
  0xc6   : > { %1183 = vrcp.f32 %v1475_v16  ;;  %v484_v31 = vand.u32 2147483648, %v1475_v16  ;;  %v417_v32 = vadd.f32 %v1454_v62, %v416_v63  ;;  %vm1575_vm6 = vmor %vm448_vm11, %vm449_vm4  ;;  %v470_v55 = vor.u32 1.1754944e-38, %v469_v17 }
  0xc7   : > { %v445_v30 = vsub.f32 1.0, %v444_v20  ;;  %v431_v39 = vmul.f32 %v1458_v1, %v430_v19  ;;  %vm468_vm14 = vcmp.eq.f32.partialorder %v467_v8, 8.507059e+37  ;;  %v406_v40 = vsel %vm1548_vm2, %v1452_v61, %v402_v18 }
  0xc8   : > { %v485_v61 = vor.u32 1.1754944e-38, %v484_v31  ;;  %v455_v52 = vor.u32 1.1754944e-38, %v454_v60  ;;  %v411_v8 = vsel %vm1534_vm1, %v1493_v33, %v406_v40  ;;  %vm1789_vm1 = vcmask 261120  }
  0xc9   : > { %v446_v54 = vmul.f32 %v1472_v15, %v445_v30  ;;  %v432_v4 = vadd.f32 %v1458_v1, %v431_v39  ;;  %v482_v30 = vand.u32 2147483647, %v1475_v16  ;;  %vm1790_vm3 = vmmov %vm1789_vm1 }
  0xca   : > { %v1182_v43 = vpop.eup %1181 }
  0xcb   : > { %v459_v34 = vmul.f32 %v1182_v43, %v1460_v2  ;;  %vm464_vm0 = vweird.f32 %v1182_v43  ;;  %v447_v23 = vadd.f32 %v1472_v15, %v446_v54  ;;  %v436_v2 = vsel %vm1563_vm9, %v1458_v1, %v432_v4 }
  0xcc   : > { %v1184_v56 = vpop.eup %1183  ;;  %vm465_vm8 = vmor %vm463_vm12, %vm464_vm0  ;;  %vm478_vm9 = vweird.f32 %v1475_v16  ;;  %vm1784_vm0 = vweird.f32 %v1429_v46  ;;  %vm483_vm12 = vcmp.eq.f32.partialorder %v482_v30, 8.507059e+37  ;;  %v1641_v46 = vmul.f32 %v411_v8, %v1410_v28  ;;  %v863_v8 = vpop.permute.xlu0 %862 }
  0xcd   : > { %v460_v0 = vsub.f32 1.0, %v459_v34  ;;  %v474_v3 = vmul.f32 %v1184_v56, %v1475_v16  ;;  %vm479_vm5 = vweird.f32 %v1184_v56  ;;  %v451_v58 = vsel %vm1575_vm6, %v1472_v15, %v447_v23  ;;  %vm1592_vm11 = vmor %vm1784_vm0, %vm419_vm13  ;;  %874 = vxpose.xlu0.b32.start [1/4] (short) (narrow) %v863_v8, 8 }
  0xce   : > { %vm480_vm2 = vmor %vm478_vm9, %vm479_vm5  ;;  %v421_v15 = vsel %vm1592_vm11, %v1454_v62, %v417_v32  ;;  %v456_v4 = vsel %vm1530_vm15, %v455_v52, %v451_v58  ;;  %vm1788_vm13 = vweird.f32 %v1425_v44  ;;  %vm423_vm15 = vcmp.eq.f32.partialorder %v422_v36, 8.507059e+37  ;;  %v587_v44 = vpop.f32.mrf.mxu0 }
  0xcf   : > { %v461_v19 = vmul.f32 %v1182_v43, %v460_v0  ;;  %v475_v20 = vsub.f32 1.0, %v474_v3  ;;  %vm1791_vm5 = vmmov %vm1789_vm1  ;;  %665 = vrot.lane.b32.xlu2 %v587_v44, %s1258_s9  ;;  %s967_s9 = scalar_lea.hbm %s1763_s4, %s1104_s5 }
  0xd0   : > { %vm1792_vm6 = vmmov %vm1789_vm1  ;;  %s971_s12 = sshll.u32 %s967_s9, 4  ;;  %s972_s12 = int_to_ptr.hbm [resolvable:$true] %s971_s12 }
  0xd1   : > { %v462_v12 = vadd.f32 %v1182_v43, %v461_v19  ;;  %v476_v35 = vmul.f32 %v1184_v56, %v475_v20  ;;  %vm1795_vm9 = vmmov %vm1789_vm1  ;;  %s1207_s13 = sshra.s32 %s972_s12, 4  ;;  %s1208_s13 = int_to_ptr.hbm [resolvable:$true] %s1207_s13 }
  0xd2   : > { %vm1796_vm0 = vmmov %vm1789_vm1  ;;  %s1209_s14 = scalar_lea.hbm %s1208_s13, 8  ;;  %p1214_p0 = scmp.lt.s32.totalorder %s1208_s13, %s1763_s4 }
  0xd3   : > { %v466_v34 = vsel %vm465_vm8, %v1182_v43, %v462_v12  ;;  %v477_v1 = vadd.f32 %v1184_v56, %v476_v35  ;;  %v441_v43 = vsel %vm1517_vm10, %v440_v57, %v436_v2  ;;  %vm1787_vm10 = vweird.f32 %v1449_v59  ;;  %vm1793_vm8 = vmmov %vm1789_vm1  ;;  %p1210_p11 = scmp.ne.s32.totalorder %s1208_s13, %s1209_s14  ;;  %p1215_p1 = scmp.lt.s32.totalorder %s1213_s23, %s1209_s14 }
  0xd4   : > { %v471_v63 = vsel %vm468_vm14, %v470_v55, %v466_v34  ;;  %vm390_vm4 = vmor %vm1788_vm13, %vm1787_vm10  ;;  %v1620_v62 = vmul.f32 %v441_v43, %v1418_v37  ;;  %v1638_v37 = vmul.f32 %v456_v4, %v1420_v38  ;;  %v219_v38 = vld [vmem:[%s1761_s2 + $0x20] sm:$0xff] }
  0xd5   : > { %v1599_v16 = vmul.f32 %v471_v63, %v1433_v50  ;;  %v481_v0 = vsel %vm480_vm2, %v1184_v56, %v477_v1  ;;  %v391_v33 = vsel %vm390_vm4, %v1449_v59, %v387_v47  ;;  %v426_v56 = vsel %vm423_vm15, %v425_v53, %v421_v15  ;;  %vm1794_vm14 = vmmov %vm1789_vm1  ;;  %p1211_p12 = pnand %p1210_p11, %p1324_p5  ;;  %p1216_p2 = por %p1215_p1, %p1214_p0 }
  0xd6   : > { %v486_v3 = vsel %vm483_vm12, %v485_v61, %v481_v0  ;;  %v1648_v59 = vmul.f32 %v426_v56, %v1412_v29  ;;  %v221_v29 = vld [vmem:[%s1761_s2 + $0x30] sm:$0xff]  ;;  %vm1797_vm11 = vmmov %vm1796_vm0  ;;  %vm700_vm12 = vcmask 64512  }
  0xd7   : > { %521 = vmatpush.msra.mxu2 %v1599_v16  ;;  %v1617_v50 = vmul.f32 %v486_v3, %v1435_v51  ;;  %v395_v51 = vor.u32 1.1754944e-38, %v394_v14  ;;  %v1651_v14 = vmul.f32 %v381_v41, %v1404_v21  ;;  %v220_v21 = vld [vmem:[%s1761_s2 + $0x28] sm:$0xff]  ;;  %vm1798_vm2 = vmmov %vm1796_vm0  ;;  %p1212_p13 = pneg %p1211_p12 }
  0xd8   : > { %vm1799_vm10 = vmmov %vm1796_vm0 }
  0xd9   : > { %550 = vmatpush.msra.mxu3 %v1617_v50  ;;  %522 = vmatpush.msra.mxu2 %v1620_v62  ;;  %v396_v49 = vsel %vm393_vm7, %v395_v51, %v391_v33  ;;  %vm1800_vm13 = vmmov %vm1796_vm0  ;;  %p1217_p3 = pnand %p1216_p2, %p1212_p13 }
  0xda   : > { %v1659_v28 = vmul.f32 %v396_v49, %v1407_v24  ;;  %v222_v24 = vld [vmem:[%s1761_s2 + $0x38] sm:$0xff]  ;;  %vm1801_vm4 = vmmov %vm1796_vm0 }
  0xdb   : > { %551 = vmatpush.msra.mxu3 %v1638_v37  ;;  %523 = vmatpush.msra.mxu2 %v1641_v46  ;;  %vm1802_vm15 = vmmov %vm1796_vm0 }
  0xdc   : > { %vm1803_vm7 = vmmov %vm1796_vm0 }
  0xdd   : > { %552 = vmatpush.msra.mxu3 %v1648_v59  ;;  %524 = vmatpush.msra.mxu2 %v1651_v14 }
  0xde   : > { %1069 = vmatmul.msk.f32.vlgmr.msra.gmra.mxu2 %vm1789_vm1, %v219_v38  ;;  %vm1804_vm1 = vmmov %vm1796_vm0 }
  0xdf   : > { %553 = vmatpush.msra.mxu3 %v1659_v28 }
  0xe0   : > { %1073 = vmatmul.msk.f32.vlgmr.msra.gmra.mxu3 %vm1790_vm3, %v219_v38  ;;  %v865_v38 = vpop.permute.xlu1 %864  ;;  %vm1805_vm3 = vmmov %vm1796_vm0 }
  0xe1   : > { %875 = vxpose.xlu0.b32.cont [2/4] (short) (narrow) %v865_v38, 8 }
  0xe6   : > { %1070 = vmatmul.msk.f32.gmra.mxu2 %vm1791_vm5, %v220_v21  ;;  %vm1806_vm5 = vmmov %vm1796_vm0 }
  0xe8   : > { %1074 = vmatmul.msk.f32.gmra.mxu3 %vm1792_vm6, %v220_v21  ;;  %vm1807_vm6 = vmmov %vm1796_vm0 }
  0xee   : > { %1071 = vmatmul.msk.f32.gmra.mxu2 %vm1793_vm8, %v221_v29  ;;  %vm1808_vm8 = vmmov %vm1796_vm0 }
  0xf0   : > { %1075 = vmatmul.msk.f32.gmra.mxu3 %vm1794_vm14, %v221_v29  ;;  %vm1809_vm14 = vcmask 1043456  }
  0xf6   : > { %1072 = vmatmul.msk.f32.gmra.mxu2 %vm1795_vm9, %v222_v24 }
  0xf8   : > { %1076 = vmatmul.msk.f32.gmra.mxu3 %vm1796_vm0, %v222_v24 }
 0x129   : > { %v666_v13 = vpop.permute.xlu2 %665 }
 0x12a   : > { %668 = vxpose.xlu2.b32.start.end [1/1] (short) (narrow) %v666_v13, 32 }
 0x161   : > { %v526_v22 = vpop.f32.mrf.mxu2 }
 0x163   : > { %v555_v25 = vpop.f32.mrf.mxu3 }
 0x169   : > { %v529_v36 = vpop.f32.mrf.mxu2 }
 0x16b   : > { %v558_v42 = vpop.f32.mrf.mxu3 }
 0x171   : > { %v532_v48 = vpop.f32.mrf.mxu2 }
 0x173   : > { %v561_v57 = vpop.f32.mrf.mxu3 }
 0x179   : > { %v535_v60 = vpop.f32.mrf.mxu2 }
 0x17a   : > { %605 = vmatpush.msrb.mxu1 %v535_v60 }
 0x17b   : > { %v564_v5 = vpop.f32.mrf.mxu3 }
 0x17c   : > { %625 = vmatpush.msrb.mxu2 %v564_v5  ;;  %606 = vmatpush.msrb.mxu1 %v532_v48 }
 0x17e   : > { %626 = vmatpush.msrb.mxu2 %v561_v57  ;;  %607 = vmatpush.msrb.mxu1 %v529_v36 }
 0x180   : > { %627 = vmatpush.msrb.mxu2 %v558_v42  ;;  %608 = vmatpush.msrb.mxu1 %v526_v22 }
 0x181   : > { %1078 = vmatmul.msk.f32.vlgmr.msrb.gmra.mxu1 %vm1797_vm11, %v587_v44 }
 0x182   : > { %628 = vmatpush.msrb.mxu2 %v555_v25 }
 0x183   : > { %1079 = vmatmul.msk.f32.vlgmr.msrb.gmra.mxu2 %vm1798_vm2, %v587_v44  ;;  %v867_v44 = vpop.permute.xlu0 %866 }
 0x184   : > { %876 = vxpose.xlu0.b32.cont [3/4] (short) (narrow) %v867_v44, 8 }
 0x1c3   : > { %v684_v35 = vpop.trf.xlu2 }
 0x1cb   : > { %v685_v55 = vpop.trf.xlu2 }
 0x1d3   : > { %v686_v47 = vpop.trf.xlu2 }
 0x1db   : > { %v687_v34 = vpop.trf.xlu2 }
 0x1fe   : > { %v610_v7 = vpop.f32.mrf.mxu1 }
 0x1ff   : > { %v633_v17 = vrot.slane %v610_v7, 4 }
 0x201   : > { %v634_v18 = vmax.f32 %v610_v7, %v633_v17  ;;  %v869_v17 = vpop.permute.xlu1 %868 }
 0x202   : > { %877 = vxpose.xlu0.b32.end [4/4] (short) (narrow) %v869_v17, 8 }
 0x203   : > { %v635_v19 = vrot.slane %v634_v18, 2 }
 0x205   : > { %v636_v20 = vmax.f32 %v634_v18, %v635_v19  ;;  %v224_v19 = vld [vmem:[%s1761_s2 + $0x48] sm:$0xff] }
 0x206   : > { %v630_v23 = vpop.f32.mrf.mxu2 }
 0x207   : > { %v637_v26 = vrot.slane %v636_v20, 1  ;;  %v639_v27 = vrot.slane %v630_v23, 4 }
 0x209   : > { %v638_v30 = vmax.f32 %v636_v20, %v637_v26  ;;  %v640_v31 = vmax.f32 %v630_v23, %v639_v27  ;;  %v225_v20 = vld [vmem:[%s1761_s2 + $0x50] sm:$0xff] }
 0x20b   : > { %v645_v45 = vsub.f32 %v610_v7, %v638_v30  ;;  %v641_v32 = vrot.slane %v640_v31, 2  ;;  %v223_v7 = vld [vmem:[%s1761_s2 + $0x40] sm:$0xff] }
 0x20d   : > { %v647_v12 = vmul.f32 1.442695, %v645_v45  ;;  %v642_v6 = vmax.f32 %v640_v31, %v641_v32  ;;  %v235_v31 = vld [vmem:[%s1762_s3] sm:$0xf]  ;;  %v1260_v45 = vmov 1  }
 0x20e   : > { %1151 = vset.pattern.permute.xlu1 %v1260_v45 }
 0x20f   : > { %1185 = vpow2.f32 %v647_v12  ;;  %v643_v9 = vrot.slane %v642_v6, 1  ;;  %859 = vperm.xlu1 %1151, %v235_v31  }
 0x211   : > { %v644_v10 = vmax.f32 %v642_v6, %v643_v9 }
 0x213   : > { %v646_v2 = vsub.f32 %v630_v23, %v644_v10  ;;  %v226_v23 = vld [vmem:[%s1761_s2 + $0x58] sm:$0xff] }
 0x215   : > { %v1186_v11 = vpop.eup %1185  ;;  %v649_v39 = vmul.f32 1.442695, %v646_v2 }
 0x216   : > { %728 = vmatpush.msrb.mxu3 %v1186_v11  ;;  %v651_v1 = vrot.slane %v1186_v11, 4 }
 0x217   : > { %1187 = vpow2.f32 %v649_v39  ;;  %1080 = vmatmul.msk.f32.vlgmr.msrb.gmra.mxu3 %vm700_vm12, %v684_v35 }
 0x218   : > { %v652_v54 = vadd.f32 %v1186_v11, %v651_v1 }
 0x21a   : > { %v653_v43 = vrot.slane %v652_v54, 2 }
 0x21c   : > { %v654_v15 = vadd.f32 %v653_v43, %v652_v54 }
 0x21d   : > { %v1188_v40 = vpop.eup %1187 }
 0x21e   : > { %757 = vmatpush.msra.mxu0 %v1188_v40  ;;  %v657_v58 = vrot.slane %v1188_v40, 4  ;;  %v655_v53 = vrot.slane %v654_v15, 1 }
 0x21f   : > { %1084 = vmatmul.msk.f32.vlgmr.msra.gmra.mxu0 %vm700_vm12, %v684_v35  ;;  %1081 = vmatmul.msk.f32.gmra.mxu3 %vm700_vm12, %v685_v55 }
 0x220   : > { %v658_v63 = vadd.f32 %v1188_v40, %v657_v58  ;;  %v656_v41 = vadd.f32 %v655_v53, %v654_v15 }
 0x222   : > { %v659_v0 = vrot.slane %v658_v63, 2  ;;  %1189 = vrcp.f32 %v656_v41 }
 0x224   : > { %v660_v3 = vadd.f32 %v659_v0, %v658_v63 }
 0x226   : > { %v661_v56 = vrot.slane %v660_v3, 1 }
 0x227   : > { %1085 = vmatmul.msk.f32.gmra.mxu0 %vm700_vm12, %v685_v55  ;;  %1082 = vmatmul.msk.f32.gmra.mxu3 %vm700_vm12, %v686_v47 }
 0x228   : > { %v662_v51 = vadd.f32 %v661_v56, %v660_v3  ;;  %v1190_v29 = vpop.eup %1189 }
 0x22a   : > { %1191 = vrcp.f32 %v662_v51 }
 0x22f   : > { %1086 = vmatmul.msk.f32.gmra.mxu0 %vm700_vm12, %v686_v47  ;;  %1083 = vmatmul.msk.f32.gmra.mxu3 %vm700_vm12, %v687_v34 }
 0x230   : > { %v1192_v22 = vpop.eup %1191 }
 0x237   : > { %1087 = vmatmul.msk.f32.gmra.mxu0 %vm700_vm12, %v687_v34 }
 0x269   : > { %1152 = vset.pattern.permute.xlu0 %v1260_v45 }
 0x28e   : > { %v890_v39 = vpop.trf.xlu0 }
 0x29a   : > { %v730_v61 = vpop.f32.mrf.mxu3 }
 0x29b   : > { %v771_v60 = vmul.f32 %v1190_v29, %v730_v61 }
 0x29c   : > { %v759_v52 = vpop.f32.mrf.mxu0 }
 0x29d   : > { %v772_v18 = vmul.f32 %v1192_v22, %v759_v52 }
 0x2a2   : > { %v733_v4 = vpop.f32.mrf.mxu3 }
 0x2a3   : > { %v773_v48 = vmul.f32 %v1190_v29, %v733_v4 }
 0x2a4   : > { %v762_v33 = vpop.f32.mrf.mxu0 }
 0x2a5   : > { %v774_v5 = vmul.f32 %v1192_v22, %v762_v33 }
 0x2aa   : > { %v736_v49 = vpop.f32.mrf.mxu3 }
 0x2ab   : > { %v775_v36 = vmul.f32 %v1190_v29, %v736_v49 }
 0x2ac   : > { %v765_v21 = vpop.f32.mrf.mxu0 }
 0x2ad   : > { %v776_v57 = vmul.f32 %v1192_v22, %v765_v21 }
 0x2b2   : > { %v739_v24 = vpop.f32.mrf.mxu3 }
 0x2b3   : > { %v777_v13 = vmul.f32 %v1190_v29, %v739_v24 }
 0x2b4   : > { %v768_v25 = vpop.f32.mrf.mxu0 }
 0x2b5   : > { %v778_v42 = vmul.f32 %v1192_v22, %v768_v25  ;;  %803 = vmatpush.msra.mxu1 %v777_v13 }
 0x2b7   : > { %832 = vmatpush.msra.mxu2 %v778_v42  ;;  %804 = vmatpush.msra.mxu1 %v775_v36 }
 0x2b9   : > { %833 = vmatpush.msra.mxu2 %v776_v57  ;;  %805 = vmatpush.msra.mxu1 %v773_v48 }
 0x2bb   : > { %834 = vmatpush.msra.mxu2 %v774_v5  ;;  %806 = vmatpush.msra.mxu1 %v771_v60 }
 0x2bc   : > { %1088 = vmatmul.msk.f32.vlgmr.msra.gmra.mxu1 %vm1799_vm10, %v223_v7 }
 0x2bd   : > { %835 = vmatpush.msra.mxu2 %v772_v18 }
 0x2be   : > { %1092 = vmatmul.msk.f32.vlgmr.msra.gmra.mxu2 %vm1800_vm13, %v223_v7 }
 0x2c4   : > { %1089 = vmatmul.msk.f32.gmra.mxu1 %vm1801_vm4, %v224_v19 }
 0x2c6   : > { %1093 = vmatmul.msk.f32.gmra.mxu2 %vm1802_vm15, %v224_v19 }
 0x2cc   : > { %1090 = vmatmul.msk.f32.gmra.mxu1 %vm1803_vm7, %v225_v20 }
 0x2ce   : > { %1094 = vmatmul.msk.f32.gmra.mxu2 %vm1804_vm1, %v225_v20 }
 0x2d4   : > { %1091 = vmatmul.msk.f32.gmra.mxu1 %vm1805_vm3, %v226_v23 }
 0x2d6   : > { %1095 = vmatmul.msk.f32.gmra.mxu2 %vm1806_vm5, %v226_v23 }
 0x339   : > { %v808_v26 = vpop.f32.mrf.mxu1 }
 0x33a   : > { %v849_v11 = vadd.f32 %v808_v26, %v1651_v14  ;;  %v860_v14 = vpop.permute.xlu1 %859 }
 0x341   : > { %v837_v27 = vpop.f32.mrf.mxu2  ;;  %v811_v30 = vpop.f32.mrf.mxu1 }
 0x342   : > { %v851_v2 = vadd.f32 %v811_v30, %v1641_v46  ;;  %v850_v46 = vadd.f32 %v837_v27, %v1659_v28 }
 0x349   : > { %v840_v32 = vpop.f32.mrf.mxu2  ;;  %v814_v12 = vpop.f32.mrf.mxu1 }
 0x34a   : > { %v853_v10 = vadd.f32 %v814_v12, %v1620_v62  ;;  %v852_v62 = vadd.f32 %v840_v32, %v1648_v59 }
 0x351   : > { %v843_v6 = vpop.f32.mrf.mxu2  ;;  %v817_v35 = vpop.f32.mrf.mxu1 }
 0x352   : > { %v855_v9 = vadd.f32 %v817_v35, %v1599_v16  ;;  %v854_v16 = vadd.f32 %v843_v6, %v1638_v37 }
 0x354   : > { %921 = vmatpush.msra.mxu3 %v855_v9 }
 0x356   : > { %922 = vmatpush.msra.mxu3 %v853_v10 }
 0x358   : > { %923 = vmatpush.msra.mxu3 %v851_v2 }
 0x359   : > { %v846_v55 = vpop.f32.mrf.mxu2 }
 0x35a   : > { %v856_v40 = vadd.f32 %v846_v55, %v1617_v50  ;;  %924 = vmatpush.msra.mxu3 %v849_v11 }
 0x35b   : > { %1096 = vmatmul.msk.f32.vlgmr.msra.gmra.mxu3 %vm1807_vm6, %v890_v39 }
 0x35c   : > { %941 = vmatpush.msrb.mxu0 %v856_v40 }
 0x35e   : > { %942 = vmatpush.msrb.mxu0 %v854_v16 }
 0x360   : > { %943 = vmatpush.msrb.mxu0 %v852_v62 }
 0x362   : > { %944 = vmatpush.msrb.mxu0 %v850_v46 }
 0x363   : > { %1097 = vmatmul.msk.f32.vlgmr.msrb.gmra.mxu0 %vm1808_vm8, %v890_v39 }
 0x3de   : > { %v926_v37 = vpop.f32.mrf.mxu3 }
 0x3df   : > { %v927_v28 = vadd.f32 %v926_v37, %v860_v14 }
 0x3e0   : > { %v946_v50 = vpop.f32.mrf.mxu0 }
 0x3e1   : > { %v947_v47 = vadd.f32 %v946_v50, %v860_v14 }
 0x3e3   : > { %v951_v59 = vrot.slane %v947_v47, 4 }
 0x3e5   : > { %v952_v34 = vsel %vm1809_vm14, %v927_v28, %v951_v59 }
 0x3e6   : > { %954 = vst [vmem:[%s203_s10] sm:$0xff] %v952_v34 }
 0x3e7   : > { %1220 = shalt.err (!%p1217_p3)
}
 0x3e8   : > { %1105 = dma.vmem_to_hbm [thread:$0]  (%p1324_p5), %s970_s11, 128, %s972_s12, %s956_s19  }
 0x3e9 PF: > { %p1111_p4 = scmp.ge.s32.totalorder %s1255_s18, 2  ;;  %s983_s27 = sand.u32 1, %s1243_s15  }
 0x3ea   : > { %s984_s28 = scalar_lea.sflag [#allocation3], %s983_s27 }
 0x3eb   : > { %p1108_p7 = pnand %p1111_p4, %p1328_p6 }
 0x3ed   : > { %p1109_p8 = pneg %p1108_p7 }
 0x3ef   : > { %1238 = dma.done.wait (%p1109_p8), %s984_s28, 128  }
 0x3f0   : > { %1240 = vsyncadd (%p1109_p8), %s984_s28, 4294967168  ;;  %p14_p9 = scmp.ge.s32.totalorder %s1311_s21, 4   ;;  %s1810_s15 = smov %s1247_s16 }
 0x3f1   : > { %s1811_s16 = smov %s1251_s17  ;;  %s1812_s17 = smov %s1322_s24 }
 0x3f2   : > { %s1813_s18 = smov %s1311_s21  ;;  %16 = sbr.rel (!%p14_p9) target bundleno = 3 (0x3), region = 74 }
 0x3f7   :  { %990 = vsyncpa [#allocation3], 1 }
 0x3f8   :  { %992 = vsyncpa [#allocation3 + $0x1], 1 }

</bundles_post_ra>
